<compile_context>
chip_gen: v6e
topology: v6e:2x2x1
jax: 0.10.0
libtpu: 0.0.40
codegen_flags: <defaults>
</compile_context>

<pallas_src>
import functools

import jax
import jax.numpy as jnp
import numpy as np
from jax.experimental import pallas as pl
from jax.experimental.pallas import tpu as pltpu

HIDDEN = 16


# --------------------------------------------------------------------------------------
# Kernel bodies
# --------------------------------------------------------------------------------------
def _mlp_log_softmax(state_ref, w1_ref, b1_ref, w2_ref, b2_ref, w3_ref, b3_ref):
    """3-layer MLP + numerically stable log-softmax + entropy, in [feature, batch] layout."""
    x = state_ref[...]                                                                   # [S, TB]

    h1 = jnp.dot(w1_ref[...], x, preferred_element_type=jnp.float32) + b1_ref[...]
    h1 = jnp.maximum(h1, 0.0)                                                            # [16, TB]
    h2 = jnp.dot(w2_ref[...], h1, preferred_element_type=jnp.float32) + b2_ref[...]
    h2 = jnp.maximum(h2, 0.0)                                                            # [16, TB]
    logits = jnp.dot(w3_ref[...], h2, preferred_element_type=jnp.float32) + b3_ref[...]  # [A, TB]

    m = jnp.max(logits, axis=0, keepdims=True)                                           # [1, TB]
    shifted = logits - m
    e = jnp.exp(shifted)
    z = jnp.sum(e, axis=0, keepdims=True)                                                # [1, TB]
    log_z = jnp.log(z)
    logp = shifted - log_z                                                               # [A, TB]

    # entropy = -sum(p*logp) = log(z) - sum(e*shifted)/z   (p never materialized)
    ent = log_z - jnp.sum(e * shifted, axis=0, keepdims=True) * pl.reciprocal(z, approx=True)
    return logp, ent


def _gather_rows(logp, idx):
    """log_prob at integer action idx [1, TB] (gather along the sublane/action axis)."""
    iota = jax.lax.broadcasted_iota(jnp.int32, logp.shape, 0)
    return jnp.sum(jnp.where(iota == idx, logp, 0.0), axis=0, keepdims=True)


def actor_sample_kernel(state_ref, gumbel_ref, w1_ref, b1_ref, w2_ref, b2_ref,
                        w3_ref, b3_ref, act_ref, logp_ref, ent_ref):
    logp, ent = _mlp_log_softmax(state_ref, w1_ref, b1_ref, w2_ref, b2_ref, w3_ref, b3_ref)

    # Categorical sampling via Gumbel-max; noise was drawn outside the kernel.
    pert = logp + gumbel_ref[...]                                                        # [A, TB]
    num_actions = pert.shape[0]
    iota = jax.lax.broadcasted_iota(jnp.int32, pert.shape, 0)
    pm = jnp.max(pert, axis=0, keepdims=True)
    # argmax with lowest-index tie-break
    idx = jnp.min(jnp.where(pert >= pm, iota, jnp.int32(num_actions)),
                  axis=0, keepdims=True)                                                 # [1, TB]

    act_ref[...] = idx
    logp_ref[...] = _gather_rows(logp, idx)
    ent_ref[...] = ent


def actor_eval_kernel(state_ref, action_ref, w1_ref, b1_ref, w2_ref, b2_ref,
                      w3_ref, b3_ref, logp_ref, ent_ref):
    logp, ent = _mlp_log_softmax(state_ref, w1_ref, b1_ref, w2_ref, b2_ref, w3_ref, b3_ref)
    logp_ref[...] = _gather_rows(logp, action_ref[...])
    ent_ref[...] = ent


# --------------------------------------------------------------------------------------
# Wrapper
# --------------------------------------------------------------------------------------
def _pad_lanes(x, tb):
    pad = (-x.shape[1]) % tb
    return jnp.pad(x, ((0, 0), (0, pad))) if pad else x


@functools.partial(jax.jit, static_argnames=("tile_b",))
def _actor_forward(state, params, key, action=None, tile_b=512):
    """Returns (act[int32, B], log_prob[f32, B], entropy[f32, B])."""
    B, S = state.shape
    A = params["w3"].shape[0]

    # Tile the batch (lane) axis.  Small B -> single full-extent block (allowed by the
    # (8,128) rule since the block equals the array dims).  Large B -> pad to a multiple
    # of tile_b (multiple of 128) and grid over it.
    tb = tile_b if B > tile_b else B
    Bp = B + ((-B) % tb)
    grid = (Bp // tb,)

    state_t = _pad_lanes(jnp.transpose(state), tb)                                       # [S, Bp]

    inv = lambda i: (0, 0)   # block-invariant: weights/biases stay resident in VMEM
    col = lambda i: (0, i)   # tile along the lane-dense batch axis

    w_specs = [
        pl.BlockSpec((HIDDEN, S), inv),          # w1 [out, in]
        pl.BlockSpec((HIDDEN, 1), inv),          # b1 [out, 1]
        pl.BlockSpec((HIDDEN, HIDDEN), inv),     # w2
        pl.BlockSpec((HIDDEN, 1), inv),          # b2
        pl.BlockSpec((A, HIDDEN), inv),          # w3
        pl.BlockSpec((A, 1), inv),               # b3
    ]
    w_args = (params["w1"], params["b1"], params["w2"], params["b2"],
              params["w3"], params["b3"])
    cparams = pltpu.CompilerParams(dimension_semantics=("parallel",))

    if action is None:
        # Gumbel(0,1) noise drawn at padded width, already in the transposed layout.
        gumbel = jax.random.gumbel(key, (A, Bp), jnp.float32)
        act, logp, ent = pl.pallas_call(
            actor_sample_kernel,
            grid=grid,
            in_specs=[pl.BlockSpec((S, tb), col),       # state^T
                      pl.BlockSpec((A, tb), col)] + w_specs,
            out_specs=(pl.BlockSpec((1, tb), col),
                       pl.BlockSpec((1, tb), col),
                       pl.BlockSpec((1, tb), col)),
            out_shape=(jax.ShapeDtypeStruct((1, Bp), jnp.int32),    # act (torch uses int64)
                       jax.ShapeDtypeStruct((1, Bp), jnp.float32),  # log_prob
                       jax.ShapeDtypeStruct((1, Bp), jnp.float32)), # entropy
            compiler_params=cparams,
        )(state_t, gumbel, *w_args)
        return act[0, :B], logp[0, :B], ent[0, :B]

    # Caller-provided action path: log_prob/entropy of given actions (no sampling).
    act_in = _pad_lanes(jnp.reshape(action.astype(jnp.int32), (1, B)), tb)               # [1, Bp]
    logp, ent = pl.pallas_call(
        actor_eval_kernel,
        grid=grid,
        in_specs=[pl.BlockSpec((S, tb), col),
                  pl.BlockSpec((1, tb), col)] + w_specs,
        out_specs=(pl.BlockSpec((1, tb), col),
                   pl.BlockSpec((1, tb), col)),
        out_shape=(jax.ShapeDtypeStruct((1, Bp), jnp.float32),
                   jax.ShapeDtypeStruct((1, Bp), jnp.float32)),
        compiler_params=cparams,
    )(state_t, act_in, *w_args)
    return action, logp[0, :B], ent[0, :B]


actor_forward = _actor_forward


def init_actor_params(key, state_dim, action_num):
    """Deterministic init mimicking nn.Linear's U(-1/sqrt(fan_in), 1/sqrt(fan_in)).

    Weights in the PyTorch [out_features, in_features] layout; biases as [out_features, 1]
    columns (broadcast along the lane/batch axis inside the kernel).
    """
    def linear(kw, kb, fan_in, fan_out):
        bound = 1.0 / np.sqrt(fan_in)
        w = jax.random.uniform(kw, (fan_out, fan_in), jnp.float32, -bound, bound)
        b = jax.random.uniform(kb, (fan_out, 1), jnp.float32, -bound, bound)
        return w, b

    k = jax.random.split(key, 6)
    w1, b1 = linear(k[0], k[1], state_dim, HIDDEN)
    w2, b2 = linear(k[2], k[3], HIDDEN, HIDDEN)
    w3, b3 = linear(k[4], k[5], HIDDEN, action_num)
    return {"w1": w1, "b1": b1, "w2": w2, "b2": b2, "w3": w3, "b3": b3}


if __name__ == "__main__":
    B, STATE_DIM, ACTION_NUM = 2, 4, 4

    key = jax.random.PRNGKey(0)
    pkey, skey, gkey = jax.random.split(key, 3)
    params = init_actor_params(pkey, STATE_DIM, ACTION_NUM)
    state = jax.random.normal(skey, (B, STATE_DIM), jnp.float32)

    # ---- sampling path ----
    act, log_prob, entropy = actor_forward(state, params, gkey)
    jax.block_until_ready((act, log_prob, entropy))

    # pure-JAX reference (same transposed math)
    h1 = jax.nn.relu(params["w1"] @ state.T + params["b1"])
    h2 = jax.nn.relu(params["w2"] @ h1 + params["b2"])
    logits = params["w3"] @ h2 + params["b3"]                       # [A, B]
    ref_logp = jax.nn.log_softmax(logits, axis=0)
    ref_probs = jax.nn.softmax(logits, axis=0)
    ref_entropy = -jnp.sum(ref_probs * ref_logp, axis=0)

    act_np = np.asarray(act)
    assert act.dtype == jnp.int32
    assert np.all((act_np >= 0) & (act_np < ACTION_NUM))
    np.testing.assert_allclose(np.asarray(log_prob),
                               np.asarray(ref_logp)[act_np, np.arange(B)],
                               atol=2e-4, rtol=2e-4)
    np.testing.assert_allclose(np.asarray(entropy), np.asarray(ref_entropy),
                               atol=1e-3, rtol=1e-3)

    # ---- caller-provided action path (Actor.forward(state, action)) ----
    given = jnp.array([1, 3], dtype=jnp.int32)
    act2, log_prob2, entropy2 = actor_forward(state, params, gkey, action=given)
    jax.block_until_ready((act2, log_prob2, entropy2))
    np.testing.assert_array_equal(np.asarray(act2), np.asarray(given))
    np.testing.assert_allclose(np.asarray(log_prob2),
                               np.asarray(ref_logp)[np.asarray(given), np.arange(B)],
                               atol=2e-4, rtol=2e-4)
    np.testing.assert_allclose(np.asarray(entropy2), np.asarray(ref_entropy),
                               atol=1e-3, rtol=1e-3)

    print("KERNEL_OK")
</pallas_src>

<mosaic_0001>
module attributes {stable_mosaic.version = 11 : i64} {
  func.func @actor_sample_kernel(%arg0: i32, %arg1: memref<4x2xf32, #tpu.memory_space<vmem>>, %arg2: memref<4x2xf32, #tpu.memory_space<vmem>>, %arg3: memref<16x4xf32, #tpu.memory_space<vmem>>, %arg4: memref<16x1xf32, #tpu.memory_space<vmem>>, %arg5: memref<16x16xf32, #tpu.memory_space<vmem>>, %arg6: memref<16x1xf32, #tpu.memory_space<vmem>>, %arg7: memref<4x16xf32, #tpu.memory_space<vmem>>, %arg8: memref<4x1xf32, #tpu.memory_space<vmem>>, %arg9: memref<1x2xi32, #tpu.memory_space<vmem>>, %arg10: memref<1x2xf32, #tpu.memory_space<vmem>>, %arg11: memref<1x2xf32, #tpu.memory_space<vmem>>) attributes {dimension_semantics = [#tpu.dimension_semantics<parallel>], iteration_bounds = array<i64: 1>, scalar_prefetch = 0 : i64, scratch_operands = 0 : i64, tpu.core_type = #tpu.core_type<tc>, window_params = [{transform_indices = @transform_0, window_bounds = array<i64: 4, 2>}, {transform_indices = @transform_1, window_bounds = array<i64: 4, 2>}, {pipeline_mode = #tpu.pipeline_mode<synchronous>, transform_indices = @transform_2, window_bounds = array<i64: 16, 4>}, {pipeline_mode = #tpu.pipeline_mode<synchronous>, transform_indices = @transform_3, window_bounds = array<i64: 16, 1>}, {pipeline_mode = #tpu.pipeline_mode<synchronous>, transform_indices = @transform_4, window_bounds = array<i64: 16, 16>}, {pipeline_mode = #tpu.pipeline_mode<synchronous>, transform_indices = @transform_5, window_bounds = array<i64: 16, 1>}, {pipeline_mode = #tpu.pipeline_mode<synchronous>, transform_indices = @transform_6, window_bounds = array<i64: 4, 16>}, {pipeline_mode = #tpu.pipeline_mode<synchronous>, transform_indices = @transform_7, window_bounds = array<i64: 4, 1>}, {transform_indices = @transform_8, window_bounds = array<i64: 1, 2>}, {transform_indices = @transform_9, window_bounds = array<i64: 1, 2>}, {transform_indices = @transform_10, window_bounds = array<i64: 1, 2>}]} {
    %c0 = arith.constant 0 : index
    %c0_0 = arith.constant 0 : index
    %0 = vector.load %arg1[%c0, %c0_0] : memref<4x2xf32, #tpu.memory_space<vmem>>, vector<4x2xf32>
    %c0_1 = arith.constant 0 : index
    %c0_2 = arith.constant 0 : index
    %1 = vector.load %arg3[%c0_1, %c0_2] : memref<16x4xf32, #tpu.memory_space<vmem>>, vector<16x4xf32>
    %cst = arith.constant dense<0.000000e+00> : vector<16x2xf32>
    %2 = tpu.matmul %1, %0, %cst {dimension_numbers = #tpu.dot_dimension_numbers<[1], [0], [0], [1], [0, 0, 1, 1], [], []>} : vector<16x4xf32>, vector<4x2xf32>, vector<16x2xf32> -> vector<16x2xf32>
    %c0_3 = arith.constant 0 : index
    %c0_4 = arith.constant 0 : index
    %3 = vector.load %arg4[%c0_3, %c0_4] : memref<16x1xf32, #tpu.memory_space<vmem>>, vector<16x1xf32>
    %4 = vector.broadcast %3 : vector<16x1xf32> to vector<16x2xf32>
    %5 = arith.addf %2, %4 : vector<16x2xf32>
    %cst_5 = arith.constant 0.000000e+00 : f32
    %6 = vector.broadcast %cst_5 : f32 to vector<16x2xf32>
    %7 = arith.maximumf %5, %6 : vector<16x2xf32>
    %c0_6 = arith.constant 0 : index
    %c0_7 = arith.constant 0 : index
    %8 = vector.load %arg5[%c0_6, %c0_7] : memref<16x16xf32, #tpu.memory_space<vmem>>, vector<16x16xf32>
    %cst_8 = arith.constant dense<0.000000e+00> : vector<16x2xf32>
    %9 = tpu.matmul %8, %7, %cst_8 {dimension_numbers = #tpu.dot_dimension_numbers<[1], [0], [0], [1], [0, 0, 1, 1], [], []>} : vector<16x16xf32>, vector<16x2xf32>, vector<16x2xf32> -> vector<16x2xf32>
    %c0_9 = arith.constant 0 : index
    %c0_10 = arith.constant 0 : index
    %10 = vector.load %arg6[%c0_9, %c0_10] : memref<16x1xf32, #tpu.memory_space<vmem>>, vector<16x1xf32>
    %11 = vector.broadcast %10 : vector<16x1xf32> to vector<16x2xf32>
    %12 = arith.addf %9, %11 : vector<16x2xf32>
    %cst_11 = arith.constant 0.000000e+00 : f32
    %13 = vector.broadcast %cst_11 : f32 to vector<16x2xf32>
    %14 = arith.maximumf %12, %13 : vector<16x2xf32>
    %c0_12 = arith.constant 0 : index
    %c0_13 = arith.constant 0 : index
    %15 = vector.load %arg7[%c0_12, %c0_13] : memref<4x16xf32, #tpu.memory_space<vmem>>, vector<4x16xf32>
    %cst_14 = arith.constant dense<0.000000e+00> : vector<4x2xf32>
    %16 = tpu.matmul %15, %14, %cst_14 {dimension_numbers = #tpu.dot_dimension_numbers<[1], [0], [0], [1], [0, 0, 1, 1], [], []>} : vector<4x16xf32>, vector<16x2xf32>, vector<4x2xf32> -> vector<4x2xf32>
    %c0_15 = arith.constant 0 : index
    %c0_16 = arith.constant 0 : index
    %17 = vector.load %arg8[%c0_15, %c0_16] : memref<4x1xf32, #tpu.memory_space<vmem>>, vector<4x1xf32>
    %18 = vector.broadcast %17 : vector<4x1xf32> to vector<4x2xf32>
    %19 = arith.addf %16, %18 : vector<4x2xf32>
    %cst_17 = arith.constant dense<0xFF800000> : vector<2xf32>
    %20 = vector.multi_reduction <maximumf>, %19, %cst_17 [0] : vector<4x2xf32> to vector<2xf32>
    %21 = vector.shape_cast %20 : vector<2xf32> to vector<1x2xf32>
    %22 = vector.broadcast %21 : vector<1x2xf32> to vector<4x2xf32>
    %23 = arith.subf %19, %22 : vector<4x2xf32>
    %24 = math.exp %23 : vector<4x2xf32>
    %cst_18 = arith.constant dense<0.000000e+00> : vector<2xf32>
    %25 = vector.multi_reduction <add>, %24, %cst_18 [0] : vector<4x2xf32> to vector<2xf32>
    %26 = vector.shape_cast %25 : vector<2xf32> to vector<1x2xf32>
    %27 = math.log %26 : vector<1x2xf32>
    %28 = vector.broadcast %27 : vector<1x2xf32> to vector<4x2xf32>
    %29 = arith.subf %23, %28 : vector<4x2xf32>
    %30 = arith.mulf %24, %23 : vector<4x2xf32>
    %cst_19 = arith.constant dense<0.000000e+00> : vector<2xf32>
    %31 = vector.multi_reduction <add>, %30, %cst_19 [0] : vector<4x2xf32> to vector<2xf32>
    %32 = vector.shape_cast %31 : vector<2xf32> to vector<1x2xf32>
    %33 = tpu.reciprocal %26 {approx = true} : vector<1x2xf32> -> vector<1x2xf32>
    %34 = arith.mulf %32, %33 : vector<1x2xf32>
    %35 = arith.subf %27, %34 : vector<1x2xf32>
    %c0_20 = arith.constant 0 : index
    %c0_21 = arith.constant 0 : index
    %36 = vector.load %arg2[%c0_20, %c0_21] : memref<4x2xf32, #tpu.memory_space<vmem>>, vector<4x2xf32>
    %37 = arith.addf %29, %36 : vector<4x2xf32>
    %38 = tpu.iota {dimensions = array<i32: 0>} : vector<4x2xi32>
    %cst_22 = arith.constant dense<0xFF800000> : vector<2xf32>
    %39 = vector.multi_reduction <maximumf>, %37, %cst_22 [0] : vector<4x2xf32> to vector<2xf32>
    %40 = vector.shape_cast %39 : vector<2xf32> to vector<1x2xf32>
    %41 = vector.broadcast %40 : vector<1x2xf32> to vector<4x2xf32>
    %42 = arith.cmpf oge, %37, %41 : vector<4x2xf32>
    %c4_i32 = arith.constant 4 : i32
    %43 = vector.broadcast %c4_i32 : i32 to vector<4x2xi32>
    %44 = arith.select %42, %38, %43 : vector<4x2xi1>, vector<4x2xi32>
    %cst_23 = arith.constant dense<2147483647> : vector<2xi32>
    %45 = vector.multi_reduction <minsi>, %44, %cst_23 [0] : vector<4x2xi32> to vector<2xi32>
    %46 = vector.shape_cast %45 : vector<2xi32> to vector<1x2xi32>
    %c0_24 = arith.constant 0 : index
    %c0_25 = arith.constant 0 : index
    %47 = vector.load %arg9[%c0_24, %c0_25] : memref<1x2xi32, #tpu.memory_space<vmem>>, vector<1x2xi32>
    tpu.vector_store %arg9[%c0_24, %c0_25], %46 {strides = array<i32>} : memref<1x2xi32, #tpu.memory_space<vmem>>, vector<1x2xi32>,
    %48 = tpu.iota {dimensions = array<i32: 0>} : vector<4x2xi32>
    %49 = vector.broadcast %46 : vector<1x2xi32> to vector<4x2xi32>
    %50 = arith.cmpi eq, %48, %49 : vector<4x2xi32>
    %cst_26 = arith.constant 0.000000e+00 : f32
    %51 = vector.broadcast %cst_26 : f32 to vector<4x2xf32>
    %52 = arith.select %50, %29, %51 : vector<4x2xi1>, vector<4x2xf32>
    %cst_27 = arith.constant dense<0.000000e+00> : vector<2xf32>
    %53 = vector.multi_reduction <add>, %52, %cst_27 [0] : vector<4x2xf32> to vector<2xf32>
    %54 = vector.shape_cast %53 : vector<2xf32> to vector<1x2xf32>
    %c0_28 = arith.constant 0 : index
    %c0_29 = arith.constant 0 : index
    %55 = vector.load %arg10[%c0_28, %c0_29] : memref<1x2xf32, #tpu.memory_space<vmem>>, vector<1x2xf32>
    tpu.vector_store %arg10[%c0_28, %c0_29], %54 {strides = array<i32>} : memref<1x2xf32, #tpu.memory_space<vmem>>, vector<1x2xf32>,
    %c0_30 = arith.constant 0 : index
    %c0_31 = arith.constant 0 : index
    %56 = vector.load %arg11[%c0_30, %c0_31] : memref<1x2xf32, #tpu.memory_space<vmem>>, vector<1x2xf32>
    tpu.vector_store %arg11[%c0_30, %c0_31], %35 {strides = array<i32>} : memref<1x2xf32, #tpu.memory_space<vmem>>, vector<1x2xf32>,
    return
  }
  func.func @transform_0(%arg0: i32) -> (i32, i32) {
    %c0_i32 = arith.constant 0 : i32
    %c0_i32_0 = arith.constant 0 : i32
    return %c0_i32, %arg0 : i32, i32
  }
  func.func @transform_1(%arg0: i32) -> (i32, i32) {
    %c0_i32 = arith.constant 0 : i32
    %c0_i32_0 = arith.constant 0 : i32
    return %c0_i32, %arg0 : i32, i32
  }
  func.func @transform_2(%arg0: i32) -> (i32, i32) {
    %c0_i32 = arith.constant 0 : i32
    %c0_i32_0 = arith.constant 0 : i32
    %c0_i32_1 = arith.constant 0 : i32
    return %c0_i32, %c0_i32_0 : i32, i32
  }
  func.func @transform_3(%arg0: i32) -> (i32, i32) {
    %c0_i32 = arith.constant 0 : i32
    %c0_i32_0 = arith.constant 0 : i32
    %c0_i32_1 = arith.constant 0 : i32
    return %c0_i32, %c0_i32_0 : i32, i32
  }
  func.func @transform_4(%arg0: i32) -> (i32, i32) {
    %c0_i32 = arith.constant 0 : i32
    %c0_i32_0 = arith.constant 0 : i32
    %c0_i32_1 = arith.constant 0 : i32
    return %c0_i32, %c0_i32_0 : i32, i32
  }
  func.func @transform_5(%arg0: i32) -> (i32, i32) {
    %c0_i32 = arith.constant 0 : i32
    %c0_i32_0 = arith.constant 0 : i32
    %c0_i32_1 = arith.constant 0 : i32
    return %c0_i32, %c0_i32_0 : i32, i32
  }
  func.func @transform_6(%arg0: i32) -> (i32, i32) {
    %c0_i32 = arith.constant 0 : i32
    %c0_i32_0 = arith.constant 0 : i32
    %c0_i32_1 = arith.constant 0 : i32
    return %c0_i32, %c0_i32_0 : i32, i32
  }
  func.func @transform_7(%arg0: i32) -> (i32, i32) {
    %c0_i32 = arith.constant 0 : i32
    %c0_i32_0 = arith.constant 0 : i32
    %c0_i32_1 = arith.constant 0 : i32
    return %c0_i32, %c0_i32_0 : i32, i32
  }
  func.func @transform_8(%arg0: i32) -> (i32, i32) {
    %c0_i32 = arith.constant 0 : i32
    %c0_i32_0 = arith.constant 0 : i32
    return %c0_i32, %arg0 : i32, i32
  }
  func.func @transform_9(%arg0: i32) -> (i32, i32) {
    %c0_i32 = arith.constant 0 : i32
    %c0_i32_0 = arith.constant 0 : i32
    return %c0_i32, %arg0 : i32, i32
  }
  func.func @transform_10(%arg0: i32) -> (i32, i32) {
    %c0_i32 = arith.constant 0 : i32
    %c0_i32_0 = arith.constant 0 : i32
    return %c0_i32, %arg0 : i32, i32
  }
}

</mosaic_0001>

<bundles_post_ra>
// kernel: _actor_forward.1
= control target key start
LH: loop header
LB: loop body
LE: loop exit
PB: predicated region body
PF: predicated region fallthrough
CT: control target
= control target key end

     0   :  { %16 = vsyncpa [#allocation3], 0  ;;  %vm56_vm0 = vcmask 1043456   ;;  %vm49_vm1 = vcmask 31744   ;;  %v537_v4 = vmov 0   ;;  %s655_s0 = inlined_call_operand.vmem [shape: f32[4,2], index: 0, kind: input, shape index: {}]   ;;  %s656_s1 = inlined_call_operand.vmem [shape: f32[4,2], index: 1, kind: input, shape index: {}]   ;;  %s657_s2 = inlined_call_operand.vmem [shape: f32[16,4], index: 2, kind: input, shape index: {}]   ;;  %s658_s3 = inlined_call_operand.vmem [shape: f32[16,1], index: 3, kind: input, shape index: {}]   ;;  %s659_s4 = inlined_call_operand.vmem [shape: f32[16,16], index: 4, kind: input, shape index: {}]   ;;  %s660_s5 = inlined_call_operand.vmem [shape: f32[16,1], index: 5, kind: input, shape index: {}]   ;;  %s661_s6 = inlined_call_operand.vmem [shape: f32[4,16], index: 6, kind: input, shape index: {}]   ;;  %s662_s7 = inlined_call_operand.vmem [shape: f32[4,1], index: 7, kind: input, shape index: {}]   ;;  %s663_s8 = inlined_call_operand.hbm [shape: s32[1,2], index: 8, kind: output, shape index: {0}]   ;;  %s664_s9 = inlined_call_operand.hbm [shape: f32[1,2], index: 9, kind: output, shape index: {1}]   ;;  %s665_s10 = inlined_call_operand.hbm [shape: f32[1,2], index: 10, kind: output, shape index: {2}]  }
   0x1   :  { %v34_v0 = vld [vmem:[%s655_s0] sm:$0xf]  ;;  %v36_v2 = vld [vmem:[%s657_s2 + $0x8] sm:$0xff]  ;;  %465 = vset.pattern.permute.xlu0 %v537_v4 }
   0x2   :  { %v35_v1 = vld [vmem:[%s657_s2] sm:$0xff]  ;;  %440 = vmatprep.subr.msk.mxu0 %vm56_vm0, %v34_v0  ;;  %v38_v3 = vld [vmem:[%s658_s3 + $0x8] sm:$0xff] }
   0x3   :  { %442 = vmatprep.mubr.msk.f32.mxu0 %vm49_vm1, %v35_v1  ;;  %441 = vmatpush3.msk.msra.mxu0 %vm56_vm0, %v34_v0 }
   0x4   :  { %17 = vsyncpa [#allocation5], 0  ;;  %443 = vmatmul.mubr.msk.f32.vlgmr.msra.gmra.mxu0 %vm49_vm1, %v36_v2  ;;  %46 = vperm.xlu0 %465, %v38_v3   ;;  %v37_v5 = vld [vmem:[%s658_s3] sm:$0xff]  ;;  %vm151_vm2 = vcmask 130048   ;;  %v140_v8 = vld [vmem:[%s660_s5 + $0x8] sm:$0xff]  ;;  %v538_v19 = vmov 0.0  }
   0x5   :  { %466 = vset.pattern.permute.xlu1 %v537_v4  ;;  %v236_v6 = vld [vmem:[%s662_s7] sm:$0xf]  ;;  %v138_v18 = vld [vmem:[%s659_s4 + $0x8] sm:$0xff]  ;;  %452 = vmatprep.subr.mxu0 %v538_v19  ;;  %vm539_vm3 = vmmov 0   ;;  %vm315_vm4 = vcmask 11264   ;;  %vm370_vm5 = vcmask 8192  }
   0x6   :  { %v137_v7 = vld [vmem:[%s659_s4] sm:$0xff]  ;;  %148 = vperm.xlu1 %466, %v140_v8   ;;  %456 = vmatprep.mubr.msk.f32.mxu0 %vm539_vm3, %v538_v19 }
   0x7   :  { %449 = vmatprep.mubr.msk.f32.mxu1 %vm151_vm2, %v137_v7  ;;  %v139_v9 = vld [vmem:[%s660_s5] sm:$0xff] }
   0x8   :  { %41 = vperm.xlu0 %465, %v37_v5   ;;  %v235_v28 = vld [vmem:[%s661_s6] sm:$0xf] }
   0x9   :  { %v347_v61 = vld [vmem:[%s656_s1] sm:$0xf]  ;;  %s540_s1 = smov [#allocation2]  }
   0xa   :  { %143 = vperm.xlu1 %466, %v139_v9   ;;  %s389_s30 = sshll.u32 %s540_s1, 4  ;;  %s390_s30 = int_to_ptr.vmem [resolvable:$true] %s389_s30 }
   0xb   :  { %s473_s11 = scalar_lea.vmem %s390_s30, 16  ;;  %s477_s12 = scalar_lea.vmem %s390_s30, 32 }
   0xc   :  { %239 = vperm.xlu0 %465, %v236_v6   ;;  %v349_v6 = vlaneseq  ;;  %p474_p0 = scmp.ne.s32.totalorder %s390_s30, %s473_s11  ;;  %p478_p1 = scmp.lt.s32.totalorder %s390_s30, %s390_s30 }
   0xd   :  { %p479_p2 = scmp.lt.s32.totalorder %s477_s12, %s473_s11 }
   0xe   :  { %v350_v9 = vshrl.u32 %v349_v6, 7 }
   0xf   :  { %p480_p3 = por %p479_p2, %p478_p1 }
  0x11   :  { %p481_p4 = pnand %p480_p3, %p474_p0 }
  0x7f   :  { %v47_v10 = vpop.permute.xlu0 %46 }
  0x81   :  { %v149_v20 = vpop.permute.xlu1 %148 }
  0x83   :  { %v42_v13 = vpop.permute.xlu0 %41 }
  0x85   :  { %v144_v23 = vpop.permute.xlu1 %143 }
  0x87   :  { %v240_v29 = vpop.permute.xlu0 %239 }
  0xc4   :  { %v444_v11 = vpop.f32.mrf.mxu0 }
  0xc5   :  { %v132_v12 = vadd.f32 %v444_v11, %v47_v10 }
  0xc6   :  { %v126_v14 = vpop.f32.mrf.mxu0 }
  0xc7   :  { %v136_v15 = vmax.f32 %v132_v12, 0.0  ;;  %v127_v16 = vadd.f32 %v126_v14, %v42_v13 }
  0xc9   :  { %v135_v17 = vmax.f32 %v127_v16, 0.0  ;;  %445 = vmatprep.subr.mxu1 %v136_v15 }
  0xca   :  { %446 = vmatpush3.msra.mxu1 %v136_v15 }
  0xcb   :  { %447 = vmatprep.subr.mxu1 %v135_v17 }
  0xcc   :  { %448 = vmatpush3.msra.mxu1 %v135_v17 }
  0xcd   :  { %450 = vmatmul.mubr.msk.f32.vlgmr.msra.gmra.mxu1 %vm151_vm2, %v138_v18 }
 0x18d   :  { %v451_v21 = vpop.f32.mrf.mxu1 }
 0x18e   :  { %v230_v22 = vadd.f32 %v451_v21, %v149_v20 }
 0x18f   :  { %v224_v24 = vpop.f32.mrf.mxu1 }
 0x190   :  { %v234_v25 = vmax.f32 %v230_v22, 0.0  ;;  %v225_v26 = vadd.f32 %v224_v24, %v144_v23 }
 0x192   :  { %v233_v27 = vmax.f32 %v225_v26, 0.0  ;;  %453 = vmatpush3.msra.mxu0 %v234_v25 }
 0x193   :  { %454 = vmatprep.subr.mxu0 %v538_v19 }
 0x194   :  { %455 = vmatpush3.msra.mxu0 %v233_v27 }
 0x195   :  { %457 = vmatmul.mubr.msk.f32.vlgmr.msra.gmra.mxu0 %vm151_vm2, %v235_v28 }
 0x255   :  { %v311_v30 = vpop.f32.mrf.mxu0 }
 0x256   :  { %v312_v31 = vadd.f32 %v311_v30, %v240_v29 }
 0x257   :  { %v458_v32 = vpop.f32.mrf.mxu0 }
 0x258   :  { %v316_v33 = vsel %vm315_vm4, %v312_v31, -inf }
 0x259   :  { %v317_v34 = vrot.slane %v316_v33, 4 }
 0x25b   :  { %v318_v35 = vmax.f32 %v316_v33, %v317_v34 }
 0x25d   :  { %v319_v36 = vrot.slane %v318_v35, 2 }
 0x25f   :  { %v320_v37 = vmax.f32 %v318_v35, %v319_v36 }
 0x261   :  { %v321_v38 = vrot.slane %v320_v37, 1 }
 0x263   :  { %v322_v39 = vmax.f32 %v320_v37, %v321_v38 }
 0x265   :  { %v323_v40 = vsub.f32 %v312_v31, %v322_v39 }
 0x267   :  { %v324_v41 = vmul.f32 1.442695, %v323_v40 }
 0x269   :  { %467 = vpow2.f32 %v324_v41 }
 0x276   :  { %v468_v42 = vpop.eup %467 }
 0x277   :  { %v326_v43 = vsel %vm315_vm4, %v468_v42, 0.0  ;;  %v336_v44 = vmul.f32 %v468_v42, %v323_v40 }
 0x278   :  { %v327_v45 = vrot.slane %v326_v43, 4 }
 0x279   :  { %v337_v47 = vsel %vm315_vm4, %v336_v44, 0.0 }
 0x27a   :  { %v328_v46 = vadd.f32 %v327_v45, %v326_v43  ;;  %v338_v49 = vrot.slane %v337_v47, 4 }
 0x27c   :  { %v329_v48 = vrot.slane %v328_v46, 2  ;;  %v339_v52 = vadd.f32 %v338_v49, %v337_v47 }
 0x27e   :  { %v330_v50 = vadd.f32 %v329_v48, %v328_v46  ;;  %v340_v54 = vrot.slane %v339_v52, 2 }
 0x280   :  { %v331_v51 = vrot.slane %v330_v50, 1  ;;  %v341_v55 = vadd.f32 %v340_v54, %v339_v52 }
 0x282   :  { %v332_v53 = vadd.f32 %v331_v51, %v330_v50  ;;  %v342_v56 = vrot.slane %v341_v55, 1 }
 0x284   :  { %469 = vlog2.f32 %v332_v53  ;;  %v343_v58 = vadd.f32 %v342_v56, %v341_v55 }
 0x285   :  { %471 = vrcp.f32 %v332_v53 }
 0x291   :  { %v470_v57 = vpop.eup %469 }
 0x292   :  { %v472_v59 = vpop.eup %471  ;;  %v334_v60 = vmul.f32 0.6931472, %v470_v57 }
 0x293   :  { %v345_v62 = vmul.f32 %v472_v59, %v343_v58 }
 0x294   :  { %v335_v63 = vsub.f32 %v323_v40, %v334_v60 }
 0x295   :  { %v346_v0 = vsub.f32 %v334_v60, %v345_v62 }
 0x296   :  { %v348_v1 = vadd.f32 %v347_v61, %v335_v63 }
 0x297   :  { %382 = vst.msk [vmem:[#allocation6] sm:$0x1] %vm370_vm5, %v346_v0 }
 0x298   :  { %v351_v2 = vsel %vm315_vm4, %v348_v1, -inf }
 0x299   :  { %v352_v3 = vrot.slane %v351_v2, 4 }
 0x29b   :  { %v353_v4 = vmax.f32 %v351_v2, %v352_v3 }
 0x29d   :  { %v354_v5 = vrot.slane %v353_v4, 2 }
 0x29f   :  { %v355_v7 = vmax.f32 %v353_v4, %v354_v5 }
 0x2a1   :  { %v356_v8 = vrot.slane %v355_v7, 1 }
 0x2a3   :  { %v357_v10 = vmax.f32 %v355_v7, %v356_v8 }
 0x2a5   :  { %vm358_vm6 = vcmp.ge.f32.partialorder %v348_v1, %v357_v10 }
 0x2a6   :  { %v359_v11 = vsel %vm358_vm6, %v350_v9, 4 }
 0x2a7   :  { %v360_v12 = vsel %vm315_vm4, %v359_v11, 2147483647 }
 0x2a8   :  { %v361_v13 = vrot.slane %v360_v12, 4 }
 0x2aa   :  { %vm362_vm7 = vcmp.lt.s32.totalorder %v360_v12, %v361_v13 }
 0x2ab   :  { %v363_v14 = vsel %vm362_vm7, %v360_v12, %v361_v13 }
 0x2ac   :  { %v364_v15 = vrot.slane %v363_v14, 2 }
 0x2ae   :  { %vm365_vm8 = vcmp.lt.s32.totalorder %v363_v14, %v364_v15 }
 0x2af   :  { %v366_v16 = vsel %vm365_vm8, %v363_v14, %v364_v15 }
 0x2b0   :  { %v367_v17 = vrot.slane %v366_v16, 1 }
 0x2b2   :  { %vm368_vm9 = vcmp.lt.s32.totalorder %v366_v16, %v367_v17 }
 0x2b3   :  { %v369_v18 = vsel %vm368_vm9, %v366_v16, %v367_v17 }
 0x2b4   :  { %vm372_vm10 = vcmp.eq.s32.totalorder %v350_v9, %v369_v18  ;;  %371 = vst.msk [vmem:[#allocation2] sm:$0x1] %vm370_vm5, %v369_v18 }
 0x2b5   :  { %v373_v19 = vsel %vm372_vm10, %v335_v63, 0.0 }
 0x2b6   :  { %484 = shalt.err (!%p481_p4)
}
 0x2b7   :  { %392 = dma.vmem_to_hbm [thread:$0]  %s390_s30, 16, %s663_s8, [#allocation3]   ;;  %v374_v20 = vsel %vm315_vm4, %v373_v19, 0.0 }
 0x2b8   :  { %v375_v21 = vrot.slane %v374_v20, 4  ;;  %s541_s15 = smov [#allocation4]   ;;  %s542_s17 = smov [#allocation6]  }
 0x2b9   :  { %s399_s16 = sshll.u32 %s541_s15, 4  ;;  %s409_s18 = sshll.u32 %s542_s17, 4  ;;  %s400_s16 = int_to_ptr.vmem [resolvable:$true] %s399_s16  ;;  %s410_s18 = int_to_ptr.vmem [resolvable:$true] %s409_s18 }
 0x2ba   :  { %v376_v22 = vadd.f32 %v375_v21, %v374_v20  ;;  %s493_s19 = scalar_lea.vmem %s400_s16, 16  ;;  %s497_s20 = scalar_lea.vmem %s400_s16, 32 }
 0x2bb   :  { %p494_p5 = scmp.ne.s32.totalorder %s400_s16, %s493_s19  ;;  %p498_p6 = scmp.lt.s32.totalorder %s400_s16, %s400_s16 }
 0x2bc   :  { %v377_v23 = vrot.slane %v376_v22, 2  ;;  %p499_p7 = scmp.lt.s32.totalorder %s497_s20, %s493_s19 }
 0x2be   :  { %v378_v24 = vadd.f32 %v377_v23, %v376_v22  ;;  %p500_p8 = por %p499_p7, %p498_p6 }
 0x2c0   :  { %v379_v25 = vrot.slane %v378_v24, 1  ;;  %p501_p9 = pnand %p500_p8, %p494_p5 }
 0x2c2   :  { %v380_v26 = vadd.f32 %v379_v25, %v378_v24 }
 0x2c4   :  { %381 = vst.msk [vmem:[#allocation4] sm:$0x1] %vm370_vm5, %v380_v26 }
 0x2c5   :  { %504 = shalt.err (!%p501_p9)
}
 0x2c6   :  { %402 = dma.vmem_to_hbm [thread:$0]  %s400_s16, 16, %s664_s9, [#allocation5]  }
 0x2c7   :  { %s513_s21 = scalar_lea.vmem %s410_s18, 16  ;;  %s517_s22 = scalar_lea.vmem %s410_s18, 32 }
 0x2c8   :  { %p514_p10 = scmp.ne.s32.totalorder %s410_s18, %s513_s21  ;;  %p518_p11 = scmp.lt.s32.totalorder %s410_s18, %s410_s18 }
 0x2c9   :  { %p519_p12 = scmp.lt.s32.totalorder %s517_s22, %s513_s21 }
 0x2cb   :  { %p520_p13 = por %p519_p12, %p518_p11 }
 0x2cd   :  { %p521_p0 = pnand %p520_p13, %p514_p10 }
 0x2cf   :  { %524 = shalt.err (!%p521_p0)
}
 0x2d0   :  { %412 = dma.vmem_to_hbm [thread:$0]  %s410_s18, 16, %s665_s10, [#allocation5]  }
 0x2d1   :  { %533 = dma.done.wait [#allocation3], 16  }
 0x2d2   :  { %534 = vsyncadd [#allocation3], 4294967280 }
 0x2d3   :  { %535 = dma.done.wait [#allocation5], 32  }
 0x2d4   :  { %536 = vsyncadd [#allocation5], 4294967264 }
 0x2d5   :  { %422 = vsyncpa [#allocation3], 1 }
 0x2d6   :  { %423 = vsyncpa [#allocation5], 1 }

</bundles_post_ra>
